<compile_context>
chip_gen: v5e
topology: v5e:2x2
jax: 0.10.0
libtpu: 0.0.40
codegen_flags: <defaults>
</compile_context>

<pallas_src>
import functools
import math

import jax
import jax.numpy as jnp
from jax.experimental import pallas as pl
from jax.experimental.pallas import tpu as pltpu


# -----------------------------------------------------------------------------
# Chip / VMEM awareness
# -----------------------------------------------------------------------------
def _vmem_capacity_bytes():
    """Per-core VMEM capacity; conservative 64 MiB (v7x) fallback."""
    try:
        info = pltpu.get_tpu_info()
        cap = getattr(info, "vmem_capacity_bytes", None)
        if cap:
            return int(cap)
    except Exception:
        pass
    return 64 * 1024 * 1024


# -----------------------------------------------------------------------------
# Kernel 1: fused Q/K/V projection (head-group batched to fill the MXU).
# -----------------------------------------------------------------------------
def qkv_proj_kernel(x_ref, w_ref, q_ref, k_ref, v_ref, *, heads_per_group,
                    head_dim):
    x = x_ref[...].astype(jnp.bfloat16)                        # (Rb, H)
    w = w_ref[...]                                              # (H, hgp*3*hd) bf16
    y = jnp.dot(x, w, preferred_element_type=jnp.float32)      # (Rb, hgp*3*hd) f32
    hd = head_dim
    for g in range(heads_per_group):                            # static, unrolled
        base = 3 * hd * g
        q_ref[g, :, :] = y[:, base:base + hd].astype(jnp.bfloat16)
        k_ref[g, :, :] = y[:, base + hd:base + 2 * hd].astype(jnp.bfloat16)
        v_ref[g, :, :] = y[:, base + 2 * hd:base + 3 * hd].astype(jnp.bfloat16)


# -----------------------------------------------------------------------------
# Kernel 2: flash attention (G heads / step) + causal block skipping
#           + fused grouped output projection.
# -----------------------------------------------------------------------------
def flash_mha_kernel(q_ref, k_ref, v_ref, wo_ref, o_ref, m_sc, l_sc, acc_sc, *,
                     group):
    qi = pl.program_id(1)
    hg = pl.program_id(2)
    ki = pl.program_id(3)

    # Reset online-softmax state at the start of every (b, q-block, head-group).
    @pl.when(ki == 0)
    def _():
        m_sc[...] = jnp.full_like(m_sc, -jnp.inf)
        l_sc[...] = jnp.zeros_like(l_sc)
        acc_sc[...] = jnp.zeros_like(acc_sc)

    def attend(masked):
        q = q_ref[...]                                          # (G, Tq, hd) bf16 (pre-scaled)
        k = k_ref[...]                                          # (G, Tk, hd) bf16
        v = v_ref[...]                                          # (G, Tk, hd) bf16
        s = jnp.einsum('gqd,gkd->gqk', q, k,
                       preferred_element_type=jnp.float32)      # (G, Tq, Tk) f32
        if masked:  # diagonal block only
            row = jax.lax.broadcasted_iota(jnp.int32, s.shape, 1)
            col = jax.lax.broadcasted_iota(jnp.int32, s.shape, 2)
            s = jnp.where(col <= row, s, -jnp.inf)
        m_prev = m_sc[...]
        m_new = jnp.maximum(m_prev, jnp.max(s, axis=-1, keepdims=True))
        alpha = jnp.exp(m_prev - m_new)                         # f32, tiny
        # bf16 EUP exp path; m/l statistics stay f32.
        p = jnp.exp((s - m_new).astype(jnp.bfloat16))           # (G, Tq, Tk) bf16
        l_sc[...] = alpha * l_sc[...] + jnp.sum(p.astype(jnp.float32),
                                                axis=-1, keepdims=True)
        acc_sc[...] = alpha * acc_sc[...] + jnp.einsum(
            'gqk,gkd->gqd', p, v, preferred_element_type=jnp.float32)
        m_sc[...] = m_new

    # Causal block structure (q/kv tiles are square and aligned):
    #   ki > qi : above the diagonal -> no compute, and no DMA (min(ki,qi) remap).
    #   ki == qi: diagonal block      -> masked attend, then finalize this group.
    #   ki < qi : fully visible       -> unmasked attend.
    @pl.when(ki < qi)
    def _():
        attend(masked=False)

    @pl.when(ki == qi)
    def _():
        attend(masked=True)
        # Finalize: the diagonal block is the last contributor under causality.
        inv_l = pl.reciprocal(l_sc[...], approx=True)           # (G, Tq, 1) f32
        attn = (acc_sc[...] * inv_l).astype(jnp.bfloat16)       # (G, Tq, hd) bf16
        y = jnp.dot(attn[0], wo_ref[0], preferred_element_type=jnp.float32)
        for g in range(1, group):                               # static, unrolled
            y = y + jnp.dot(attn[g], wo_ref[g],
                            preferred_element_type=jnp.float32)

        # First head group assigns the resident output block, later groups
        # accumulate -- no separate zero-init pass.
        @pl.when(hg == 0)
        def _():
            o_ref[...] = y

        @pl.when(hg > 0)
        def _():
            o_ref[...] += y


# -----------------------------------------------------------------------------
# Tile selection (VMEM-aware, per chip)
# -----------------------------------------------------------------------------
def _heads_per_group(num_heads, head_dim, target_n=256):
    """Smallest head group whose fused QKV matmul width (3*hd*hg) is a
    TPU-friendly N (>=256 and 128-aligned); falls back to all heads."""
    for hg in range(1, num_heads):
        n = 3 * head_dim * hg
        if num_heads % hg == 0 and n >= target_n and n % 128 == 0:
            return hg
    return num_heads


def _pick_phase1_row_tile(BT, H, hd, hgp, budget):
    """Largest row tile whose double-buffered working set fits the budget."""
    cands = [c for c in (2048, 1024, 512, 256, 128, 64, 32, 16, 8) if BT % c == 0]
    if not cands:
        return BT
    for rb in cands:  # descending
        est = (2 * rb * H * 4                 # x f32 tile, double-buffered
               + 2 * H * 3 * hd * hgp * 2     # weight slice bf16, double-buffered
               + 2 * 3 * hgp * rb * hd * 2)   # Q/K/V out blocks bf16, double-buffered
        if est <= budget:
            return rb
    return cands[-1]


def _pick_phase2_tiles(T, H, hd, num_heads, budget):
    """(seq tile Tb, heads-per-step G) fitting the VMEM budget; prefers big Tb."""
    t_cands = [c for c in (512, 256, 128, 64) if T % c == 0] or [T]
    g_cands = [g for g in (4, 2, 1) if num_heads % g == 0]
    for tb in t_cands:          # descending
        for g in g_cands:       # descending
            est = (2 * tb * H * 4               # resident f32 out block (dbl-buffered)
                   + 6 * g * tb * hd * 2        # Q/K/V blocks bf16 (dbl-buffered)
                   + 2 * g * hd * H * 2         # wo block bf16 (dbl-buffered)
                   + g * tb * (hd + 2) * 4      # online-softmax scratch
                   + 12 * g * tb * tb           # (Tq,Tk) score / prob temporaries
                   + 2 * tb * H * 4)            # out-proj accumulator + headroom
            if est <= budget:
                return tb, g
    return t_cands[-1], 1


# -----------------------------------------------------------------------------
# Parameter preparation (one-time, at load)
# -----------------------------------------------------------------------------
def prepare_mha_params(w_q, w_k, w_v, w_o, num_heads):
    """torch nn.Linear weights are (out_features, in_features); y = x @ W.T.

    Returns:
      w_qkv    : (H, num_heads*3*hd) bf16, per-head [Wq|Wk|Wv] column blocks,
                 with the 1/sqrt(hd) attention scale folded into the Q columns.
      w_o_head : (num_heads, hd, H) bf16 per-head slices of out_net.
    """
    H = w_q.shape[0]
    hd = H // num_heads
    scale = 1.0 / math.sqrt(hd)
    eq = (w_q.T * scale).reshape(H, num_heads, hd)
    ek = w_k.T.reshape(H, num_heads, hd)
    ev = w_v.T.reshape(H, num_heads, hd)
    w_qkv = jnp.stack([eq, ek, ev], axis=2).reshape(H, num_heads * 3 * hd)
    w_o_head = w_o.T.reshape(num_heads, hd, H)
    return w_qkv.astype(jnp.bfloat16), w_o_head.astype(jnp.bfloat16)


# -----------------------------------------------------------------------------
# Wrapper
# -----------------------------------------------------------------------------
def multi_head_attention(x, w_qkv, w_o_head, num_heads):
    """x: (B, T, H) f32; returns (B, T, H) f32 (eval-mode forward)."""
    B, T, H = x.shape
    assert H % num_heads == 0
    hd = H // num_heads
    BT = B * T

    vmem_cap = _vmem_capacity_bytes()
    vmem_limit = min(int(vmem_cap * 0.875), vmem_cap - (4 << 20))
    budget = int(vmem_limit * 0.75)

    # ---- Phase 1: fused QKV projection over flattened rows ------------------
    hgp = _heads_per_group(num_heads, hd)
    n_g = num_heads // hgp
    Rb = _pick_phase1_row_tile(BT, H, hd, hgp, budget)
    n_r = BT // Rb
    x2 = x.reshape(BT, H)

    qkv_shape = jax.ShapeDtypeStruct((num_heads, BT, hd), jnp.bfloat16)
    q, k, v = pl.pallas_call(
        functools.partial(qkv_proj_kernel, heads_per_group=hgp, head_dim=hd),
        out_shape=(qkv_shape, qkv_shape, qkv_shape),
        grid_spec=pltpu.PrefetchScalarGridSpec(
            num_scalar_prefetch=0,
            grid=(n_r, n_g),
            in_specs=[
                pl.BlockSpec((Rb, H), lambda r, g: (r, 0)),
                pl.BlockSpec((H, 3 * hd * hgp), lambda r, g: (0, g)),
            ],
            out_specs=[
                pl.BlockSpec((hgp, Rb, hd), lambda r, g: (g, r, 0)),
                pl.BlockSpec((hgp, Rb, hd), lambda r, g: (g, r, 0)),
                pl.BlockSpec((hgp, Rb, hd), lambda r, g: (g, r, 0)),
            ],
        ),
        compiler_params=pltpu.CompilerParams(
            dimension_semantics=("parallel", "parallel"),
            vmem_limit_bytes=vmem_limit),
    )(x2, w_qkv)

    # ---- Phase 2: flash attention + fused grouped output projection ---------
    Tb, G = _pick_phase2_tiles(T, H, hd, num_heads, budget)
    n_qt = T // Tb
    n_hg = num_heads // G

    out = pl.pallas_call(
        functools.partial(flash_mha_kernel, group=G),
        out_shape=jax.ShapeDtypeStruct((B, T, H), x.dtype),
        grid_spec=pltpu.PrefetchScalarGridSpec(
            num_scalar_prefetch=0,
            grid=(B, n_qt, n_hg, n_qt),
            in_specs=[
                pl.BlockSpec((G, Tb, hd),
                             lambda b, qi, h, ki: (h, b * n_qt + qi, 0)),
                # min(ki, qi): skipped causal blocks reuse the resident K/V tile
                # (DMA elided), halving K/V HBM traffic.
                pl.BlockSpec((G, Tb, hd),
                             lambda b, qi, h, ki:
                             (h, b * n_qt + jnp.minimum(ki, qi), 0)),
                pl.BlockSpec((G, Tb, hd),
                             lambda b, qi, h, ki:
                             (h, b * n_qt + jnp.minimum(ki, qi), 0)),
                pl.BlockSpec((G, hd, H), lambda b, qi, h, ki: (h, 0, 0)),
            ],
            out_specs=pl.BlockSpec((None, Tb, H),
                                   lambda b, qi, h, ki: (b, qi, 0)),
            scratch_shapes=[
                pltpu.VMEM((G, Tb, 1), jnp.float32),    # running row max
                pltpu.VMEM((G, Tb, 1), jnp.float32),    # running denominator
                pltpu.VMEM((G, Tb, hd), jnp.float32),   # unnormalized attention acc
            ],
        ),
        compiler_params=pltpu.CompilerParams(
            dimension_semantics=("parallel", "parallel", "arbitrary", "arbitrary"),
            vmem_limit_bytes=vmem_limit),
    )(q, k, v, w_o_head)
    return out
    # TODO(synk): dropout on attention probabilities / output is identity here
    # (inference semantics); training parity would need pltpu.prng_seed/prng_random_bits.


def _reference(x, w_q, w_k, w_v, w_o, num_heads):
    """Plain-JAX f32 reference mirroring the PyTorch module (eval mode)."""
    B, T, H = x.shape
    hd = H // num_heads

    def proj(w):
        y = x @ w.T
        y = y.reshape(B, T, num_heads, hd).transpose(0, 2, 1, 3)
        return y.reshape(B * num_heads, T, hd)

    q, k, v = proj(w_q), proj(w_k), proj(w_v)
    scores = (q @ jnp.swapaxes(k, 1, 2)) / math.sqrt(hd)
    mask = jnp.tril(jnp.ones((T, T), dtype=bool))
    scores = jnp.where(mask[None], scores, -jnp.inf)
    p = jax.nn.softmax(scores, axis=-1)
    out = p @ v
    out = out.reshape(B, num_heads, T, hd).transpose(0, 2, 1, 3).reshape(B, T, H)
    return out @ w_o.T


if __name__ == "__main__":
    B, T, H, num_heads = 2, 8, 32, 4

    key = jax.random.PRNGKey(0)
    kx, kq, kk, kv, ko = jax.random.split(key, 5)
    bound = 1.0 / math.sqrt(H)  # nn.Linear default uniform init range
    x = jax.random.normal(kx, (B, T, H), dtype=jnp.float32)
    w_q = jax.random.uniform(kq, (H, H), jnp.float32, -bound, bound)
    w_k = jax.random.uniform(kk, (H, H), jnp.float32, -bound, bound)
    w_v = jax.random.uniform(kv, (H, H), jnp.float32, -bound, bound)
    w_o = jax.random.uniform(ko, (H, H), jnp.float32, -bound, bound)

    w_qkv, w_o_head = prepare_mha_params(w_q, w_k, w_v, w_o, num_heads)
    out = multi_head_attention(x, w_qkv, w_o_head, num_heads)
    out = jax.block_until_ready(out)

    ref = _reference(x, w_q, w_k, w_v, w_o, num_heads)
    assert out.shape == (B, T, H)
    # bf16 MXU inputs / bf16 exp (f32 stats & accumulation) vs an all-f32 reference.
    assert jnp.allclose(out, ref, atol=3e-2, rtol=3e-2), "mismatch vs reference"

    print("KERNEL_OK")
</pallas_src>

<mosaic_0001>
module attributes {stable_mosaic.version = 11 : i64} {
  func.func @qkv_proj_kernel(%arg0: i32, %arg1: i32, %arg2: memref<16x32xf32, #tpu.memory_space<vmem>>, %arg3: memref<32x96xbf16, #tpu.memory_space<vmem>>, %arg4: memref<4x16x8xbf16, #tpu.memory_space<vmem>>, %arg5: memref<4x16x8xbf16, #tpu.memory_space<vmem>>, %arg6: memref<4x16x8xbf16, #tpu.memory_space<vmem>>) attributes {dimension_semantics = [#tpu.dimension_semantics<parallel>, #tpu.dimension_semantics<parallel>], iteration_bounds = array<i64: 1, 1>, scalar_prefetch = 0 : i64, scratch_operands = 0 : i64, tpu.core_type = #tpu.core_type<tc>, window_params = [{transform_indices = @transform_0, window_bounds = array<i64: 16, 32>}, {transform_indices = @transform_1, window_bounds = array<i64: 32, 96>}, {transform_indices = @transform_2, window_bounds = array<i64: 4, 16, 8>}, {transform_indices = @transform_3, window_bounds = array<i64: 4, 16, 8>}, {transform_indices = @transform_4, window_bounds = array<i64: 4, 16, 8>}]} {
    %c0 = arith.constant 0 : index
    %c0_0 = arith.constant 0 : index
    %0 = vector.load %arg2[%c0, %c0_0] : memref<16x32xf32, #tpu.memory_space<vmem>>, vector<16x32xf32>
    %1 = arith.truncf %0 : vector<16x32xf32> to vector<16x32xbf16>
    %c0_1 = arith.constant 0 : index
    %c0_2 = arith.constant 0 : index
    %2 = vector.load %arg3[%c0_1, %c0_2] : memref<32x96xbf16, #tpu.memory_space<vmem>>, vector<32x96xbf16>
    %cst = arith.constant dense<0.000000e+00> : vector<16x96xf32>
    %3 = tpu.matmul %1, %2, %cst {dimension_numbers = #tpu.dot_dimension_numbers<[1], [0], [0], [1], [0, 0, 1, 1], [], []>} : vector<16x32xbf16>, vector<32x96xbf16>, vector<16x96xf32> -> vector<16x96xf32>
    %4 = vector.extract_strided_slice %3 {offsets = [0, 0], sizes = [16, 8], strides = [1, 1]} : vector<16x96xf32> to vector<16x8xf32>
    %5 = arith.truncf %4 : vector<16x8xf32> to vector<16x8xbf16>
    %c0_3 = arith.constant 0 : index
    %c0_4 = arith.constant 0 : index
    %c0_5 = arith.constant 0 : index
    %6 = vector.load %arg4[%c0_3, %c0_4, %c0_5] : memref<4x16x8xbf16, #tpu.memory_space<vmem>>, vector<1x16x8xbf16>
    %7 = vector.shape_cast %6 : vector<1x16x8xbf16> to vector<16x8xbf16>
    %8 = vector.shape_cast %5 : vector<16x8xbf16> to vector<1x16x8xbf16>
    tpu.vector_store %arg4[%c0_3, %c0_4, %c0_5], %8 {strides = array<i32>} : memref<4x16x8xbf16, #tpu.memory_space<vmem>>, vector<1x16x8xbf16>,
    %9 = vector.extract_strided_slice %3 {offsets = [0, 8], sizes = [16, 8], strides = [1, 1]} : vector<16x96xf32> to vector<16x8xf32>
    %10 = arith.truncf %9 : vector<16x8xf32> to vector<16x8xbf16>
    %c0_6 = arith.constant 0 : index
    %c0_7 = arith.constant 0 : index
    %c0_8 = arith.constant 0 : index
    %11 = vector.load %arg5[%c0_6, %c0_7, %c0_8] : memref<4x16x8xbf16, #tpu.memory_space<vmem>>, vector<1x16x8xbf16>
    %12 = vector.shape_cast %11 : vector<1x16x8xbf16> to vector<16x8xbf16>
    %13 = vector.shape_cast %10 : vector<16x8xbf16> to vector<1x16x8xbf16>
    tpu.vector_store %arg5[%c0_6, %c0_7, %c0_8], %13 {strides = array<i32>} : memref<4x16x8xbf16, #tpu.memory_space<vmem>>, vector<1x16x8xbf16>,
    %14 = vector.extract_strided_slice %3 {offsets = [0, 16], sizes = [16, 8], strides = [1, 1]} : vector<16x96xf32> to vector<16x8xf32>
    %15 = arith.truncf %14 : vector<16x8xf32> to vector<16x8xbf16>
    %c0_9 = arith.constant 0 : index
    %c0_10 = arith.constant 0 : index
    %c0_11 = arith.constant 0 : index
    %16 = vector.load %arg6[%c0_9, %c0_10, %c0_11] : memref<4x16x8xbf16, #tpu.memory_space<vmem>>, vector<1x16x8xbf16>
    %17 = vector.shape_cast %16 : vector<1x16x8xbf16> to vector<16x8xbf16>
    %18 = vector.shape_cast %15 : vector<16x8xbf16> to vector<1x16x8xbf16>
    tpu.vector_store %arg6[%c0_9, %c0_10, %c0_11], %18 {strides = array<i32>} : memref<4x16x8xbf16, #tpu.memory_space<vmem>>, vector<1x16x8xbf16>,
    %19 = vector.extract_strided_slice %3 {offsets = [0, 24], sizes = [16, 8], strides = [1, 1]} : vector<16x96xf32> to vector<16x8xf32>
    %20 = arith.truncf %19 : vector<16x8xf32> to vector<16x8xbf16>
    %c1 = arith.constant 1 : index
    %c0_12 = arith.constant 0 : index
    %c0_13 = arith.constant 0 : index
    %21 = vector.load %arg4[%c1, %c0_12, %c0_13] : memref<4x16x8xbf16, #tpu.memory_space<vmem>>, vector<1x16x8xbf16>
    %22 = vector.shape_cast %21 : vector<1x16x8xbf16> to vector<16x8xbf16>
    %23 = vector.shape_cast %20 : vector<16x8xbf16> to vector<1x16x8xbf16>
    tpu.vector_store %arg4[%c1, %c0_12, %c0_13], %23 {strides = array<i32>} : memref<4x16x8xbf16, #tpu.memory_space<vmem>>, vector<1x16x8xbf16>,
    %24 = vector.extract_strided_slice %3 {offsets = [0, 32], sizes = [16, 8], strides = [1, 1]} : vector<16x96xf32> to vector<16x8xf32>
    %25 = arith.truncf %24 : vector<16x8xf32> to vector<16x8xbf16>
    %c1_14 = arith.constant 1 : index
    %c0_15 = arith.constant 0 : index
    %c0_16 = arith.constant 0 : index
    %26 = vector.load %arg5[%c1_14, %c0_15, %c0_16] : memref<4x16x8xbf16, #tpu.memory_space<vmem>>, vector<1x16x8xbf16>
    %27 = vector.shape_cast %26 : vector<1x16x8xbf16> to vector<16x8xbf16>
    %28 = vector.shape_cast %25 : vector<16x8xbf16> to vector<1x16x8xbf16>
    tpu.vector_store %arg5[%c1_14, %c0_15, %c0_16], %28 {strides = array<i32>} : memref<4x16x8xbf16, #tpu.memory_space<vmem>>, vector<1x16x8xbf16>,
    %29 = vector.extract_strided_slice %3 {offsets = [0, 40], sizes = [16, 8], strides = [1, 1]} : vector<16x96xf32> to vector<16x8xf32>
    %30 = arith.truncf %29 : vector<16x8xf32> to vector<16x8xbf16>
    %c1_17 = arith.constant 1 : index
    %c0_18 = arith.constant 0 : index
    %c0_19 = arith.constant 0 : index
    %31 = vector.load %arg6[%c1_17, %c0_18, %c0_19] : memref<4x16x8xbf16, #tpu.memory_space<vmem>>, vector<1x16x8xbf16>
    %32 = vector.shape_cast %31 : vector<1x16x8xbf16> to vector<16x8xbf16>
    %33 = vector.shape_cast %30 : vector<16x8xbf16> to vector<1x16x8xbf16>
    tpu.vector_store %arg6[%c1_17, %c0_18, %c0_19], %33 {strides = array<i32>} : memref<4x16x8xbf16, #tpu.memory_space<vmem>>, vector<1x16x8xbf16>,
    %34 = vector.extract_strided_slice %3 {offsets = [0, 48], sizes = [16, 8], strides = [1, 1]} : vector<16x96xf32> to vector<16x8xf32>
    %35 = arith.truncf %34 : vector<16x8xf32> to vector<16x8xbf16>
    %c2 = arith.constant 2 : index
    %c0_20 = arith.constant 0 : index
    %c0_21 = arith.constant 0 : index
    %36 = vector.load %arg4[%c2, %c0_20, %c0_21] : memref<4x16x8xbf16, #tpu.memory_space<vmem>>, vector<1x16x8xbf16>
    %37 = vector.shape_cast %36 : vector<1x16x8xbf16> to vector<16x8xbf16>
    %38 = vector.shape_cast %35 : vector<16x8xbf16> to vector<1x16x8xbf16>
    tpu.vector_store %arg4[%c2, %c0_20, %c0_21], %38 {strides = array<i32>} : memref<4x16x8xbf16, #tpu.memory_space<vmem>>, vector<1x16x8xbf16>,
    %39 = vector.extract_strided_slice %3 {offsets = [0, 56], sizes = [16, 8], strides = [1, 1]} : vector<16x96xf32> to vector<16x8xf32>
    %40 = arith.truncf %39 : vector<16x8xf32> to vector<16x8xbf16>
    %c2_22 = arith.constant 2 : index
    %c0_23 = arith.constant 0 : index
    %c0_24 = arith.constant 0 : index
    %41 = vector.load %arg5[%c2_22, %c0_23, %c0_24] : memref<4x16x8xbf16, #tpu.memory_space<vmem>>, vector<1x16x8xbf16>
    %42 = vector.shape_cast %41 : vector<1x16x8xbf16> to vector<16x8xbf16>
    %43 = vector.shape_cast %40 : vector<16x8xbf16> to vector<1x16x8xbf16>
    tpu.vector_store %arg5[%c2_22, %c0_23, %c0_24], %43 {strides = array<i32>} : memref<4x16x8xbf16, #tpu.memory_space<vmem>>, vector<1x16x8xbf16>,
    %44 = vector.extract_strided_slice %3 {offsets = [0, 64], sizes = [16, 8], strides = [1, 1]} : vector<16x96xf32> to vector<16x8xf32>
    %45 = arith.truncf %44 : vector<16x8xf32> to vector<16x8xbf16>
    %c2_25 = arith.constant 2 : index
    %c0_26 = arith.constant 0 : index
    %c0_27 = arith.constant 0 : index
    %46 = vector.load %arg6[%c2_25, %c0_26, %c0_27] : memref<4x16x8xbf16, #tpu.memory_space<vmem>>, vector<1x16x8xbf16>
    %47 = vector.shape_cast %46 : vector<1x16x8xbf16> to vector<16x8xbf16>
    %48 = vector.shape_cast %45 : vector<16x8xbf16> to vector<1x16x8xbf16>
    tpu.vector_store %arg6[%c2_25, %c0_26, %c0_27], %48 {strides = array<i32>} : memref<4x16x8xbf16, #tpu.memory_space<vmem>>, vector<1x16x8xbf16>,
    %49 = vector.extract_strided_slice %3 {offsets = [0, 72], sizes = [16, 8], strides = [1, 1]} : vector<16x96xf32> to vector<16x8xf32>
    %50 = arith.truncf %49 : vector<16x8xf32> to vector<16x8xbf16>
    %c3 = arith.constant 3 : index
    %c0_28 = arith.constant 0 : index
    %c0_29 = arith.constant 0 : index
    %51 = vector.load %arg4[%c3, %c0_28, %c0_29] : memref<4x16x8xbf16, #tpu.memory_space<vmem>>, vector<1x16x8xbf16>
    %52 = vector.shape_cast %51 : vector<1x16x8xbf16> to vector<16x8xbf16>
    %53 = vector.shape_cast %50 : vector<16x8xbf16> to vector<1x16x8xbf16>
    tpu.vector_store %arg4[%c3, %c0_28, %c0_29], %53 {strides = array<i32>} : memref<4x16x8xbf16, #tpu.memory_space<vmem>>, vector<1x16x8xbf16>,
    %54 = vector.extract_strided_slice %3 {offsets = [0, 80], sizes = [16, 8], strides = [1, 1]} : vector<16x96xf32> to vector<16x8xf32>
    %55 = arith.truncf %54 : vector<16x8xf32> to vector<16x8xbf16>
    %c3_30 = arith.constant 3 : index
    %c0_31 = arith.constant 0 : index
    %c0_32 = arith.constant 0 : index
    %56 = vector.load %arg5[%c3_30, %c0_31, %c0_32] : memref<4x16x8xbf16, #tpu.memory_space<vmem>>, vector<1x16x8xbf16>
    %57 = vector.shape_cast %56 : vector<1x16x8xbf16> to vector<16x8xbf16>
    %58 = vector.shape_cast %55 : vector<16x8xbf16> to vector<1x16x8xbf16>
    tpu.vector_store %arg5[%c3_30, %c0_31, %c0_32], %58 {strides = array<i32>} : memref<4x16x8xbf16, #tpu.memory_space<vmem>>, vector<1x16x8xbf16>,
    %59 = vector.extract_strided_slice %3 {offsets = [0, 88], sizes = [16, 8], strides = [1, 1]} : vector<16x96xf32> to vector<16x8xf32>
    %60 = arith.truncf %59 : vector<16x8xf32> to vector<16x8xbf16>
    %c3_33 = arith.constant 3 : index
    %c0_34 = arith.constant 0 : index
    %c0_35 = arith.constant 0 : index
    %61 = vector.load %arg6[%c3_33, %c0_34, %c0_35] : memref<4x16x8xbf16, #tpu.memory_space<vmem>>, vector<1x16x8xbf16>
    %62 = vector.shape_cast %61 : vector<1x16x8xbf16> to vector<16x8xbf16>
    %63 = vector.shape_cast %60 : vector<16x8xbf16> to vector<1x16x8xbf16>
    tpu.vector_store %arg6[%c3_33, %c0_34, %c0_35], %63 {strides = array<i32>} : memref<4x16x8xbf16, #tpu.memory_space<vmem>>, vector<1x16x8xbf16>,
    return
  }
  func.func @transform_0(%arg0: i32, %arg1: i32) -> (i32, i32) {
    %c0_i32 = arith.constant 0 : i32
    %c0_i32_0 = arith.constant 0 : i32
    return %arg0, %c0_i32 : i32, i32
  }
  func.func @transform_1(%arg0: i32, %arg1: i32) -> (i32, i32) {
    %c0_i32 = arith.constant 0 : i32
    %c0_i32_0 = arith.constant 0 : i32
    return %c0_i32, %arg1 : i32, i32
  }
  func.func @transform_2(%arg0: i32, %arg1: i32) -> (i32, i32, i32) {
    %c0_i32 = arith.constant 0 : i32
    %c0_i32_0 = arith.constant 0 : i32
    return %arg1, %arg0, %c0_i32 : i32, i32, i32
  }
  func.func @transform_3(%arg0: i32, %arg1: i32) -> (i32, i32, i32) {
    %c0_i32 = arith.constant 0 : i32
    %c0_i32_0 = arith.constant 0 : i32
    return %arg1, %arg0, %c0_i32 : i32, i32, i32
  }
  func.func @transform_4(%arg0: i32, %arg1: i32) -> (i32, i32, i32) {
    %c0_i32 = arith.constant 0 : i32
    %c0_i32_0 = arith.constant 0 : i32
    return %arg1, %arg0, %c0_i32 : i32, i32, i32
  }
}

</mosaic_0001>

<bundles_post_ra>
// kernel: tpu_custom_call.1
= control target key start
LH: loop header
LB: loop body
LE: loop exit
PB: predicated region body
PF: predicated region fallthrough
CT: control target
= control target key end

     0   :  { %10 = vsyncpa [#allocation3], 0  ;;  %s446_s0 = inlined_call_operand.hbm [shape: f32[16,32], index: 0, kind: input, shape index: {}]   ;;  %s447_s1 = inlined_call_operand.hbm [shape: bf16[32,96], index: 1, kind: input, shape index: {}]   ;;  %s448_s2 = inlined_call_operand.vmem [shape: bf16[4,16,8], index: 2, kind: output, shape index: {0}]   ;;  %s449_s3 = inlined_call_operand.vmem [shape: bf16[4,16,8], index: 3, kind: output, shape index: {1}]   ;;  %s450_s4 = inlined_call_operand.vmem [shape: bf16[4,16,8], index: 4, kind: output, shape index: {2}]  }
   0x1   :  { %s16_s17 = sshll.u32 %s446_s0, 4  ;;  %s17_s17 = int_to_ptr.hbm [resolvable:$true] %s16_s17 }
   0x2   :  { %11 = vsyncpa [#allocation5], 0  ;;  %s299_s18 = smov [#allocation2]   ;;  %s29_s22 = sshll.u32 %s447_s1, 4  ;;  %s30_s22 = int_to_ptr.hbm [resolvable:$true] %s29_s22 }
   0x3   :  { %s18_s19 = sshll.u32 %s299_s18, 4  ;;  %s300_s23 = smov 128   ;;  %s19_s19 = int_to_ptr.vmem [resolvable:$true] %s18_s19 }
   0x4   :  { %s301_s24 = smov 8   ;;  %s302_s25 = smov [#allocation4]  }
   0x5   :  { %24 = dma.hbm_to_vmem [thread:$0]  %s17_s17, 256, %s19_s19, [#allocation3], %s300_s23, %s300_s23, %s301_s24  }
   0x6   :  { %s31_s26 = sshll.u32 %s302_s25, 4  ;;  %s303_s27 = smov 64   ;;  %s32_s26 = int_to_ptr.vmem [resolvable:$true] %s31_s26 }
   0x7   :  { %s304_s28 = smov 4  }
   0x8   :  { %37 = dma.hbm_to_vmem [thread:$0]  %s30_s22, 256, %s32_s26, [#allocation5], %s303_s27, %s303_s27, %s304_s28  }
   0x9   :  { %295 = dma.done.wait [#allocation3], 256  }
   0xa   :  { %296 = vsyncadd [#allocation3], 4294967040 }
   0xb   :  { %297 = dma.done.wait [#allocation5], 256  }
   0xc   :  { %298 = vsyncadd [#allocation5], 4294967040  ;;  %v230_v0 = vld [vmem:[#allocation4 + $0x8] sm:$0xff]  ;;  %v229_v1 = vld [vmem:[#allocation4] sm:$0xff]  ;;  %vm66_vm0 = vcmask 261120   ;;  %vm86_vm1 = vcmask 60416  }
   0xd   :  { %76 = vmatpush.bf16.msra.mxu0 %v230_v0  ;;  %v47_v2 = vld [vmem:[#allocation2] sm:$0xff]  ;;  %v48_v3 = vld [vmem:[#allocation2 + $0x8] sm:$0xff]  ;;  %s305_s29 = smov 104   ;;  %s306_s30 = smov 112  }
   0xe   :  { %v49_v4 = vpack.c.bf16 %v48_v3, %v47_v2  ;;  %s307_s5 = smov 120   ;;  %s308_s8 = smov 88  }
   0xf   :  { %s309_s9 = smov 80   ;;  %s310_s10 = smov 96  }
  0x10   :  { %s311_s11 = smov 56   ;;  %s312_s12 = smov 72  }
  0x11   :  { %77 = vmatpush.bf16.msra.mxu0 %v229_v1  ;;  %s313_s13 = smov 48   ;;  %s314_s14 = smov 40  }
  0x14   :  { %210 = vmatmul.msk.bf16.vlgmr.msra.gmra.mxu0 %vm66_vm0, %v49_v4 }
  0x91   :  { %v79_v5 = vpop.f32.mrf.mxu0 }
  0x92   :  { %v84_v6 = vpack.c.bf16 %v79_v5, %v79_v5 }
  0x94   :  { %87 = vst.msk [vmem:[%s448_s2] sm:$0xf] %vm86_vm1, %v84_v6  ;;  %107 = vrot.lane.b32.xlu2 %v84_v6, %s305_s29  ;;  %99 = vrot.lane.b32.xlu1 %v84_v6, %s306_s30 }
  0x95   :  { %91 = vrot.lane.b32.xlu0 %v84_v6, %s307_s5 }
  0x99   :  { %v81_v7 = vpop.f32.mrf.mxu0 }
  0x9a   :  { %v85_v8 = vpack.c.bf16 %v81_v7, %v81_v7 }
  0x9c   :  { %88 = vst.msk [vmem:[%s448_s2 + $0x4] sm:$0xf] %vm86_vm1, %v85_v8  ;;  %125 = vrot.lane.b32.xlu2 %v84_v6, %s308_s8  ;;  %134 = vrot.lane.b32.xlu1 %v84_v6, %s309_s9 }
  0x9d   :  { %116 = vrot.lane.b32.xlu0 %v84_v6, %s310_s10 }
  0xa4   :  { %152 = vrot.lane.b32.xlu2 %v84_v6, %s303_s27  ;;  %161 = vrot.lane.b32.xlu1 %v84_v6, %s311_s11 }
  0xa5   :  { %143 = vrot.lane.b32.xlu0 %v84_v6, %s312_s12 }
  0xac   :  { %109 = vrot.lane.b32.xlu2 %v85_v8, %s305_s29  ;;  %101 = vrot.lane.b32.xlu1 %v85_v8, %s306_s30 }
  0xad   :  { %170 = vrot.lane.b32.xlu0 %v84_v6, %s313_s13 }
  0xb4   :  { %136 = vrot.lane.b32.xlu2 %v85_v8, %s309_s9  ;;  %118 = vrot.lane.b32.xlu1 %v85_v8, %s310_s10 }
  0xb5   :  { %93 = vrot.lane.b32.xlu0 %v85_v8, %s307_s5 }
  0xbc   :  { %163 = vrot.lane.b32.xlu2 %v85_v8, %s311_s11  ;;  %145 = vrot.lane.b32.xlu1 %v85_v8, %s312_s12 }
  0xbd   :  { %127 = vrot.lane.b32.xlu0 %v85_v8, %s308_s8 }
  0xc4   :  { %179 = vrot.lane.b32.xlu2 %v84_v6, %s314_s14  ;;  %172 = vrot.lane.b32.xlu1 %v85_v8, %s313_s13 }
  0xc5   :  { %154 = vrot.lane.b32.xlu0 %v85_v8, %s303_s27 }
  0xcd   :  { %181 = vrot.lane.b32.xlu0 %v85_v8, %s314_s14 }
  0xee   :  { %v108_v9 = vpop.permute.xlu2 %107 }
  0xef   :  { %211 = vst.msk [vmem:[%s448_s2 + $0x8] sm:$0xf] %vm86_vm1, %v108_v9 }
  0xf6   :  { %v126_v10 = vpop.permute.xlu2 %125 }
  0xf7   :  { %215 = vst.msk [vmem:[%s450_s4 + $0x8] sm:$0xf] %vm86_vm1, %v126_v10 }
  0xfe   :  { %v153_v11 = vpop.permute.xlu2 %152 }
  0xff   :  { %221 = vst.msk [vmem:[%s450_s4 + $0x10] sm:$0xf] %vm86_vm1, %v153_v11 }
 0x106   :  { %v100_v12 = vpop.permute.xlu1 %99  ;;  %v110_v13 = vpop.permute.xlu2 %109 }
 0x107   :  { %105 = vst.msk [vmem:[%s450_s4] sm:$0xf] %vm86_vm1, %v100_v12  ;;  %v92_v14 = vpop.permute.xlu0 %91 }
 0x108   :  { %97 = vst.msk [vmem:[%s449_s3] sm:$0xf] %vm86_vm1, %v92_v14 }
 0x109   :  { %212 = vst.msk [vmem:[%s448_s2 + $0xc] sm:$0xf] %vm86_vm1, %v110_v13 }
 0x10e   :  { %v135_v15 = vpop.permute.xlu1 %134  ;;  %v137_v16 = vpop.permute.xlu2 %136 }
 0x10f   :  { %217 = vst.msk [vmem:[%s448_s2 + $0x10] sm:$0xf] %vm86_vm1, %v135_v15  ;;  %v117_v17 = vpop.permute.xlu0 %116 }
 0x110   :  { %213 = vst.msk [vmem:[%s449_s3 + $0x8] sm:$0xf] %vm86_vm1, %v117_v17 }
 0x111   :  { %218 = vst.msk [vmem:[%s448_s2 + $0x14] sm:$0xf] %vm86_vm1, %v137_v16 }
 0x116   :  { %v162_v18 = vpop.permute.xlu1 %161  ;;  %v164_v19 = vpop.permute.xlu2 %163 }
 0x117   :  { %223 = vst.msk [vmem:[%s448_s2 + $0x18] sm:$0xf] %vm86_vm1, %v162_v18  ;;  %v144_v20 = vpop.permute.xlu0 %143 }
 0x118   :  { %219 = vst.msk [vmem:[%s449_s3 + $0x10] sm:$0xf] %vm86_vm1, %v144_v20 }
 0x119   :  { %224 = vst.msk [vmem:[%s448_s2 + $0x1c] sm:$0xf] %vm86_vm1, %v164_v19 }
 0x11e   :  { %v180_v21 = vpop.permute.xlu2 %179  ;;  %v102_v22 = vpop.permute.xlu1 %101 }
 0x11f   :  { %v171_v23 = vpop.permute.xlu0 %170  ;;  %227 = vst.msk [vmem:[%s450_s4 + $0x18] sm:$0xf] %vm86_vm1, %v180_v21 }
 0x120   :  { %225 = vst.msk [vmem:[%s449_s3 + $0x18] sm:$0xf] %vm86_vm1, %v171_v23 }
 0x121   :  { %106 = vst.msk [vmem:[%s450_s4 + $0x4] sm:$0xf] %vm86_vm1, %v102_v22 }
 0x126   :  { %v119_v24 = vpop.permute.xlu1 %118 }
 0x127   :  { %214 = vst.msk [vmem:[%s449_s3 + $0xc] sm:$0xf] %vm86_vm1, %v119_v24  ;;  %v94_v25 = vpop.permute.xlu0 %93 }
 0x128   :  { %98 = vst.msk [vmem:[%s449_s3 + $0x4] sm:$0xf] %vm86_vm1, %v94_v25 }
 0x12e   :  { %v146_v26 = vpop.permute.xlu1 %145 }
 0x12f   :  { %220 = vst.msk [vmem:[%s449_s3 + $0x14] sm:$0xf] %vm86_vm1, %v146_v26  ;;  %v128_v27 = vpop.permute.xlu0 %127 }
 0x130   :  { %216 = vst.msk [vmem:[%s450_s4 + $0xc] sm:$0xf] %vm86_vm1, %v128_v27 }
 0x136   :  { %v173_v28 = vpop.permute.xlu1 %172 }
 0x137   :  { %226 = vst.msk [vmem:[%s449_s3 + $0x1c] sm:$0xf] %vm86_vm1, %v173_v28  ;;  %v155_v29 = vpop.permute.xlu0 %154 }
 0x138   :  { %222 = vst.msk [vmem:[%s450_s4 + $0x14] sm:$0xf] %vm86_vm1, %v155_v29 }
 0x13f   :  { %v182_v30 = vpop.permute.xlu0 %181 }
 0x140   :  { %228 = vst.msk [vmem:[%s450_s4 + $0x1c] sm:$0xf] %vm86_vm1, %v182_v30 }
 0x141   :  { %200 = vsyncpa [#allocation3], 1 }
 0x142   :  { %201 = vsyncpa [#allocation5], 1 }

</bundles_post_ra>
